<compile_context>
chip_gen: v7x
topology: tpu7x:2x2x1
jax: 0.10.0
libtpu: 0.0.40
codegen_flags: <defaults>
</compile_context>

<pallas_src>
import numpy as np
import jax
import jax.numpy as jnp
from jax.scipy.linalg import block_diag
from jax.experimental import pallas as pl
from jax.experimental.pallas import tpu as pltpu

# ----------------------- configuration (synthetic surrogate) -----------------------
N_NODES = 4          # number of DNPU activation nodes in the layer
N_ELECTRODES = 7     # electrodes per DNPU device
D_IN = 3             # data-input electrodes per node (inputs_list has 3 indices/node)
N_CTRL = N_ELECTRODES - D_IN
H = 32               # hidden width of the surrogate MLP
AMPLIFICATION = 28.5 # surrogate-model output amplification
TB_MAX = 512         # batch-row tile for the kernel grid

D_TOT = N_NODES * D_IN   # 12  : fused input width
H_TOT = N_NODES * H      # 128 : fused hidden width


def _round_up(n, m):
    return ((n + m - 1) // m) * m


# ----------------------------- Pallas kernel (hot path) ----------------------------
def dnpu_layer_kernel(x_ref, w1_ref, b1_ref, w2_ref, b2_ref, w3_ref, b3_ref, o_ref):
    # x_ref: (TB, N_NODES*D_IN) raw layer input for TB batch rows (all nodes fused).
    h = jnp.dot(x_ref[...], w1_ref[...], preferred_element_type=jnp.float32) + b1_ref[...]
    h = jnp.maximum(h, 0.0)
    h = jnp.dot(h, w2_ref[...], preferred_element_type=jnp.float32) + b2_ref[...]
    h = jnp.maximum(h, 0.0)
    out = jnp.dot(h, w3_ref[...], preferred_element_type=jnp.float32) + b3_ref[...]
    o_ref[...] = (out * AMPLIFICATION).astype(o_ref.dtype)


# --------------------- parameter folding (batch-independent glue) ------------------
def fold_dnpu_params(params, inputs_list, control_list, all_controls):
    """Fold the electrode scatter + per-node control voltages into block-diagonal
    MLP weights so the kernel can consume x directly."""
    w1, b1, w2, b2, w3, b3 = params
    n_nodes = inputs_list.shape[0]

    # First layer: keep only the data-input rows of w1 per node; fold the
    # control-voltage contribution into the bias.
    w1_blocks = [w1[inputs_list[i]] for i in range(n_nodes)]                  # (D_IN, H)
    b1_eff = jnp.stack([b1[0] + all_controls[i] @ w1[control_list[i]]
                        for i in range(n_nodes)])                             # (n_nodes, H)

    w1_blk = block_diag(*w1_blocks)                                           # (D_TOT, H_TOT)
    b1_blk = b1_eff.reshape(1, n_nodes * H)                                   # (1, H_TOT)
    w2_blk = block_diag(*([w2] * n_nodes))                                    # (H_TOT, H_TOT)
    b2_blk = jnp.tile(b2, (1, n_nodes))                                       # (1, H_TOT)
    w3_blk = block_diag(*([w3] * n_nodes))                                    # (H_TOT, n_nodes)
    b3_blk = jnp.tile(b3, (1, n_nodes))                                       # (1, n_nodes)
    return w1_blk, b1_blk, w2_blk, b2_blk, w3_blk, b3_blk


# ----------------------------------- forward ---------------------------------------
def dnpu_layer_forward(x, params, inputs_list, control_list, all_controls):
    """x: (B, N_NODES*D_IN) float32 -> (B, N_NODES) float32."""
    B = x.shape[0]
    assert x.shape[-1] == inputs_list.size, (
        f"size mismatch: data is {x.shape}, DNPU_Layer expecting {inputs_list.size}")

    w1_blk, b1_blk, w2_blk, b2_blk, w3_blk, b3_blk = fold_dnpu_params(
        params, inputs_list, control_list, all_controls)

    # Large batch tile: amortize per-grid-step overhead; whole (tiny) batch otherwise.
    TB = min(TB_MAX, _round_up(B, 8))
    B_pad = _round_up(B, TB)
    x_pad = jnp.pad(x.astype(jnp.float32), ((0, B_pad - B), (0, 0)))

    out = pl.pallas_call(
        dnpu_layer_kernel,
        out_shape=jax.ShapeDtypeStruct((B_pad, N_NODES), jnp.float32),
        grid_spec=pltpu.PrefetchScalarGridSpec(
            num_scalar_prefetch=0,
            grid=(B_pad // TB,),
            in_specs=[
                pl.BlockSpec((TB, D_TOT), lambda i: (i, 0)),       # x batch tile
                pl.BlockSpec((D_TOT, H_TOT), lambda i: (0, 0)),    # W1 block-diag
                pl.BlockSpec((1, H_TOT), lambda i: (0, 0)),        # b1 (controls folded)
                pl.BlockSpec((H_TOT, H_TOT), lambda i: (0, 0)),    # W2 block-diag
                pl.BlockSpec((1, H_TOT), lambda i: (0, 0)),        # b2
                pl.BlockSpec((H_TOT, N_NODES), lambda i: (0, 0)),  # W3 block-diag
                pl.BlockSpec((1, N_NODES), lambda i: (0, 0)),      # b3
            ],
            out_specs=pl.BlockSpec((TB, N_NODES), lambda i: (i, 0)),
        ),
        compiler_params=pltpu.CompilerParams(
            dimension_semantics=("parallel",)),
    )(x_pad, w1_blk, b1_blk, w2_blk, b2_blk, w3_blk, b3_blk)

    # Padded rows are garbage; slice them off.  Columns already match
    # torch.cat([node outputs], dim=1).
    return out[:B]


# ------------------------------- reference (pure JAX) -------------------------------
def dnpu_layer_reference(x, params, inputs_list, control_list, all_controls):
    B = x.shape[0]
    w1, b1, w2, b2, w3, b3 = params
    outs = []
    for i in range(N_NODES):
        data = jnp.zeros((B, N_ELECTRODES), jnp.float32)
        data = data.at[:, inputs_list[i]].set(x[:, i * D_IN:(i + 1) * D_IN])
        data = data.at[:, control_list[i]].set(
            jnp.broadcast_to(all_controls[i], (B, N_CTRL)))
        h = jnp.maximum(data @ w1 + b1, 0.0)
        h = jnp.maximum(h @ w2 + b2, 0.0)
        outs.append((h @ w3 + b3) * AMPLIFICATION)                   # (B, 1)
    return jnp.concatenate(outs, axis=1)                             # (B, N_NODES)


# --------------------------------------- main ---------------------------------------
if __name__ == "__main__":
    key = jax.random.PRNGKey(0)
    k_x, k_x2, k_c, k1, k2, k3 = jax.random.split(key, 6)

    # inputs_list: data-input electrode indices per node; control_list: complement.
    # Heterogeneous across nodes to exercise the per-node fold.
    inputs_list = np.array([[0, 1, 2], [1, 2, 3], [0, 2, 4], [3, 4, 5]],
                           dtype=np.int32)                                   # (N_NODES, D_IN)
    control_list = np.array(
        [sorted(set(range(N_ELECTRODES)) - set(inputs_list[i].tolist()))
         for i in range(N_NODES)], dtype=np.int32)                           # (N_NODES, N_CTRL)

    # Learnable per-node control voltages, uniform in a plausible voltage range.
    all_controls = jax.random.uniform(k_c, (N_NODES, N_CTRL),
                                      minval=-0.7, maxval=0.3, dtype=jnp.float32)

    # Deterministic synthetic surrogate-model weights (shared across nodes).
    # TODO(synk): a trained checkpointed surrogate model is not loaded; weights are synthetic.
    w1 = jax.random.normal(k1, (N_ELECTRODES, H), jnp.float32) * 0.3
    b1 = jnp.zeros((1, H), jnp.float32)
    w2 = jax.random.normal(k2, (H, H), jnp.float32) * 0.2
    b2 = jnp.zeros((1, H), jnp.float32)
    w3 = jax.random.normal(k3, (H, 1), jnp.float32) * 0.2
    b3 = jnp.zeros((1, 1), jnp.float32)
    params = (w1, b1, w2, b2, w3, b3)

    # --- small batch (spec example): (batch=2, n_nodes*D_IN=12) ---
    B = 2
    x = jax.random.uniform(k_x, (B, N_NODES * D_IN),
                           minval=-0.4, maxval=0.4, dtype=jnp.float32)
    y = jax.block_until_ready(
        dnpu_layer_forward(x, params, inputs_list, control_list, all_controls))
    y_ref = dnpu_layer_reference(x, params, inputs_list, control_list, all_controls)
    np.testing.assert_allclose(np.asarray(y), np.asarray(y_ref), rtol=1e-4, atol=1e-4)
    assert y.shape == (B, N_NODES)

    # --- larger batch: exercises multi-block grid + batch padding ---
    B2 = 600
    x2 = jax.random.uniform(k_x2, (B2, N_NODES * D_IN),
                            minval=-0.4, maxval=0.4, dtype=jnp.float32)
    y2 = jax.block_until_ready(
        dnpu_layer_forward(x2, params, inputs_list, control_list, all_controls))
    y2_ref = dnpu_layer_reference(x2, params, inputs_list, control_list, all_controls)
    np.testing.assert_allclose(np.asarray(y2), np.asarray(y2_ref), rtol=1e-4, atol=1e-4)
    assert y2.shape == (B2, N_NODES)

    print("KERNEL_OK")
</pallas_src>

<mosaic_0001>
module attributes {stable_mosaic.version = 11 : i64} {
  func.func @dnpu_layer_kernel(%arg0: i32, %arg1: memref<8x12xf32, #tpu.memory_space<vmem>>, %arg2: memref<12x128xf32, #tpu.memory_space<vmem>>, %arg3: memref<1x128xf32, #tpu.memory_space<vmem>>, %arg4: memref<128x128xf32, #tpu.memory_space<vmem>>, %arg5: memref<1x128xf32, #tpu.memory_space<vmem>>, %arg6: memref<128x4xf32, #tpu.memory_space<vmem>>, %arg7: memref<1x4xf32, #tpu.memory_space<vmem>>, %arg8: memref<8x4xf32, #tpu.memory_space<vmem>>) attributes {dimension_semantics = [#tpu.dimension_semantics<parallel>], iteration_bounds = array<i64: 1>, scalar_prefetch = 0 : i64, scratch_operands = 0 : i64, tpu.core_type = #tpu.core_type<tc>, window_params = [{transform_indices = @transform_0, window_bounds = array<i64: 8, 12>}, {pipeline_mode = #tpu.pipeline_mode<synchronous>, transform_indices = @transform_1, window_bounds = array<i64: 12, 128>}, {pipeline_mode = #tpu.pipeline_mode<synchronous>, transform_indices = @transform_2, window_bounds = array<i64: 1, 128>}, {pipeline_mode = #tpu.pipeline_mode<synchronous>, transform_indices = @transform_3, window_bounds = array<i64: 128, 128>}, {pipeline_mode = #tpu.pipeline_mode<synchronous>, transform_indices = @transform_4, window_bounds = array<i64: 1, 128>}, {pipeline_mode = #tpu.pipeline_mode<synchronous>, transform_indices = @transform_5, window_bounds = array<i64: 128, 4>}, {pipeline_mode = #tpu.pipeline_mode<synchronous>, transform_indices = @transform_6, window_bounds = array<i64: 1, 4>}, {transform_indices = @transform_7, window_bounds = array<i64: 8, 4>}]} {
    %c0 = arith.constant 0 : index
    %c0_0 = arith.constant 0 : index
    %0 = vector.load %arg1[%c0, %c0_0] : memref<8x12xf32, #tpu.memory_space<vmem>>, vector<8x12xf32>
    %c0_1 = arith.constant 0 : index
    %c0_2 = arith.constant 0 : index
    %1 = vector.load %arg2[%c0_1, %c0_2] : memref<12x128xf32, #tpu.memory_space<vmem>>, vector<12x128xf32>
    %cst = arith.constant dense<0.000000e+00> : vector<8x128xf32>
    %2 = tpu.matmul %0, %1, %cst {dimension_numbers = #tpu.dot_dimension_numbers<[1], [0], [0], [1], [0, 0, 1, 1], [], []>} : vector<8x12xf32>, vector<12x128xf32>, vector<8x128xf32> -> vector<8x128xf32>
    %c0_3 = arith.constant 0 : index
    %c0_4 = arith.constant 0 : index
    %3 = vector.load %arg3[%c0_3, %c0_4] : memref<1x128xf32, #tpu.memory_space<vmem>>, vector<1x128xf32>
    %4 = vector.broadcast %3 : vector<1x128xf32> to vector<8x128xf32>
    %5 = arith.addf %2, %4 : vector<8x128xf32>
    %cst_5 = arith.constant 0.000000e+00 : f32
    %6 = vector.broadcast %cst_5 : f32 to vector<8x128xf32>
    %7 = arith.maximumf %5, %6 : vector<8x128xf32>
    %c0_6 = arith.constant 0 : index
    %c0_7 = arith.constant 0 : index
    %8 = vector.load %arg4[%c0_6, %c0_7] : memref<128x128xf32, #tpu.memory_space<vmem>>, vector<128x128xf32>
    %cst_8 = arith.constant dense<0.000000e+00> : vector<8x128xf32>
    %9 = tpu.matmul %7, %8, %cst_8 {dimension_numbers = #tpu.dot_dimension_numbers<[1], [0], [0], [1], [0, 0, 1, 1], [], []>} : vector<8x128xf32>, vector<128x128xf32>, vector<8x128xf32> -> vector<8x128xf32>
    %c0_9 = arith.constant 0 : index
    %c0_10 = arith.constant 0 : index
    %10 = vector.load %arg5[%c0_9, %c0_10] : memref<1x128xf32, #tpu.memory_space<vmem>>, vector<1x128xf32>
    %11 = vector.broadcast %10 : vector<1x128xf32> to vector<8x128xf32>
    %12 = arith.addf %9, %11 : vector<8x128xf32>
    %cst_11 = arith.constant 0.000000e+00 : f32
    %13 = vector.broadcast %cst_11 : f32 to vector<8x128xf32>
    %14 = arith.maximumf %12, %13 : vector<8x128xf32>
    %c0_12 = arith.constant 0 : index
    %c0_13 = arith.constant 0 : index
    %15 = vector.load %arg6[%c0_12, %c0_13] : memref<128x4xf32, #tpu.memory_space<vmem>>, vector<128x4xf32>
    %cst_14 = arith.constant dense<0.000000e+00> : vector<8x4xf32>
    %16 = tpu.matmul %14, %15, %cst_14 {dimension_numbers = #tpu.dot_dimension_numbers<[1], [0], [0], [1], [0, 0, 1, 1], [], []>} : vector<8x128xf32>, vector<128x4xf32>, vector<8x4xf32> -> vector<8x4xf32>
    %c0_15 = arith.constant 0 : index
    %c0_16 = arith.constant 0 : index
    %17 = vector.load %arg7[%c0_15, %c0_16] : memref<1x4xf32, #tpu.memory_space<vmem>>, vector<1x4xf32>
    %18 = vector.broadcast %17 : vector<1x4xf32> to vector<8x4xf32>
    %19 = arith.addf %16, %18 : vector<8x4xf32>
    %cst_17 = arith.constant 2.850000e+01 : f32
    %20 = vector.broadcast %cst_17 : f32 to vector<8x4xf32>
    %21 = arith.mulf %19, %20 : vector<8x4xf32>
    %c0_18 = arith.constant 0 : index
    %c0_19 = arith.constant 0 : index
    %22 = vector.load %arg8[%c0_18, %c0_19] : memref<8x4xf32, #tpu.memory_space<vmem>>, vector<8x4xf32>
    tpu.vector_store %arg8[%c0_18, %c0_19], %21 {strides = array<i32>} : memref<8x4xf32, #tpu.memory_space<vmem>>, vector<8x4xf32>,
    return
  }
  func.func @transform_0(%arg0: i32) -> (i32, i32) {
    %c0_i32 = arith.constant 0 : i32
    %c0_i32_0 = arith.constant 0 : i32
    return %arg0, %c0_i32 : i32, i32
  }
  func.func @transform_1(%arg0: i32) -> (i32, i32) {
    %c0_i32 = arith.constant 0 : i32
    %c0_i32_0 = arith.constant 0 : i32
    %c0_i32_1 = arith.constant 0 : i32
    return %c0_i32, %c0_i32_0 : i32, i32
  }
  func.func @transform_2(%arg0: i32) -> (i32, i32) {
    %c0_i32 = arith.constant 0 : i32
    %c0_i32_0 = arith.constant 0 : i32
    %c0_i32_1 = arith.constant 0 : i32
    return %c0_i32, %c0_i32_0 : i32, i32
  }
  func.func @transform_3(%arg0: i32) -> (i32, i32) {
    %c0_i32 = arith.constant 0 : i32
    %c0_i32_0 = arith.constant 0 : i32
    %c0_i32_1 = arith.constant 0 : i32
    return %c0_i32, %c0_i32_0 : i32, i32
  }
  func.func @transform_4(%arg0: i32) -> (i32, i32) {
    %c0_i32 = arith.constant 0 : i32
    %c0_i32_0 = arith.constant 0 : i32
    %c0_i32_1 = arith.constant 0 : i32
    return %c0_i32, %c0_i32_0 : i32, i32
  }
  func.func @transform_5(%arg0: i32) -> (i32, i32) {
    %c0_i32 = arith.constant 0 : i32
    %c0_i32_0 = arith.constant 0 : i32
    %c0_i32_1 = arith.constant 0 : i32
    return %c0_i32, %c0_i32_0 : i32, i32
  }
  func.func @transform_6(%arg0: i32) -> (i32, i32) {
    %c0_i32 = arith.constant 0 : i32
    %c0_i32_0 = arith.constant 0 : i32
    %c0_i32_1 = arith.constant 0 : i32
    return %c0_i32, %c0_i32_0 : i32, i32
  }
  func.func @transform_7(%arg0: i32) -> (i32, i32) {
    %c0_i32 = arith.constant 0 : i32
    %c0_i32_0 = arith.constant 0 : i32
    return %arg0, %c0_i32 : i32, i32
  }
}

</mosaic_0001>

<bundles_post_ra>
// kernel: tpu_custom_call.1
= control target key start
LH: loop header
LB: loop body
LE: loop exit
PB: predicated region body
PF: predicated region fallthrough
CT: control target
= control target key end

     0   :  { %12 = vsyncpa [#allocation3], 0  ;;  %s526_s24 = smov [#allocation2]   ;;  %s716_s0 = inlined_call_operand.vmem [shape: f32[8,12], index: 0, kind: input, shape index: {}]   ;;  %s717_s1 = inlined_call_operand.hbm [shape: f32[12,128], index: 1, kind: input, shape index: {}]   ;;  %s718_s2 = inlined_call_operand.vmem [shape: f32[1,128], index: 2, kind: input, shape index: {}]   ;;  %s719_s3 = inlined_call_operand.vmem [shape: f32[128,128], index: 3, kind: input, shape index: {}]   ;;  %s720_s4 = inlined_call_operand.vmem [shape: f32[1,128], index: 4, kind: input, shape index: {}]   ;;  %s721_s5 = inlined_call_operand.vmem [shape: f32[128,4], index: 5, kind: input, shape index: {}]   ;;  %s722_s6 = inlined_call_operand.vmem [shape: f32[1,4], index: 6, kind: input, shape index: {}]   ;;  %s723_s7 = inlined_call_operand.vmem [shape: f32[8,4], index: 7, kind: output, shape index: {}]  }
   0x1   :  { %s20_s25 = sshll.u32 %s526_s24, 4  ;;  %s502_s28 = scalar_lea.hbm %s717_s1, 256  ;;  %s21_s25 = int_to_ptr.vmem [resolvable:$true] %s20_s25 }
   0x2   :  { %p503_p0 = scmp.ne.s32.totalorder %s717_s1, %s502_s28  ;;  %p506_p1 = scmp.lt.u32.totalorder %s502_s28, %s717_s1 }
   0x4   :  { %p508_p2 = pnand %p506_p1, %p503_p0 }
   0x6   :  { %511 = shalt.err (!%p508_p2)
}
   0x7   :  { %s512_s10 = scalar_lea.vmem %s21_s25, 256  ;;  %p517_p4 = scmp.lt.s32.totalorder %s21_s25, %s21_s25 }
   0x8   :  { %p513_p3 = scmp.ne.s32.totalorder %s21_s25, %s512_s10  ;;  %p518_p5 = scmp.lt.s32.totalorder %s512_s10, %s512_s10 }
   0xa   :  { %p519_p6 = por %p518_p5, %p517_p4 }
   0xc   :  { %p520_p7 = pnand %p519_p6, %p513_p3 }
   0xe   :  { %523 = shalt.err (!%p520_p7)
}
   0xf   :  { %s527_s11 = smov 128   ;;  %s528_s12 = smov 8  }
  0x10   :  { %26 = dma.hbm_to_vmem [thread:$0]  %s717_s1, 256, %s21_s25, [#allocation3], %s527_s11, %s527_s11, %s528_s12  }
  0x11   :  { %524 = dma.done.wait [#allocation3], 256  }
  0x12   :  { %525 = vsyncadd [#allocation3], 4294967040  ;;  %v529_v0 = vmov 0.0|0.0   ;;  %vm530_vm0 = vmmov 0   ;;  %v531_v1 = vmov 0.0   ;;  %vm54_vm1 = vcmask 1043456  }
  0x13   :  { %443 = vmatprep.subr.bf16.mxu0 %v529_v0  ;;  %447 = vmatprep.subr.bf16.mxu1 %v529_v0  ;;  %v41_v2 = vld [vmem:[#allocation2] sm:$0xff]  ;;  %v42_v3 = vld [vmem:[#allocation2 + $0x8] sm:$0xf]  ;;  %vm532_vm2 = vmmov 1   ;;  %v131_v7 = vld [vmem:[%s719_s3 + $0x10] sm:$0xff]  ;;  %vm50_vm4 = vcmask 97280  }
  0x14   :  { %370 = vmatprep.mubr.msk.f32.mxu0 %vm530_vm0, %v531_v1  ;;  %405 = vmatprep.mubr.msk.f32.mxu1 %vm530_vm0, %v531_v1  ;;  %vm445_vm3 = vmpackc.low %vm54_vm1, %vm532_vm2  ;;  %v444_v4 = vpack.c.bf16 %v42_v3, %v41_v2  ;;  %v129_v5 = vld [vmem:[%s719_s3] sm:$0xff]  ;;  %v130_v6 = vld [vmem:[%s719_s3 + $0x8] sm:$0xff]  ;;  %vm317_vm5 = vcmask 31744  }
  0x15   :  { %v448_v8 = vpack.c.bf16 %v130_v6, %v129_v5  ;;  %v132_v9 = vld [vmem:[%s719_s3 + $0x18] sm:$0xff]  ;;  %v40_v10 = vld [vmem:[%s716_s0] sm:$0xff]  ;;  %v134_v13 = vld [vmem:[%s719_s3 + $0x28] sm:$0xff] }
  0x16   :  { %446 = vmatpush3.bf16.msk.msra.mxu0 %vm445_vm3, %v444_v4  ;;  %v451_v11 = vpack.c.bf16 %v132_v9, %v131_v7  ;;  %v133_v12 = vld [vmem:[%s719_s3 + $0x20] sm:$0xff]  ;;  %v135_v15 = vld [vmem:[%s719_s3 + $0x30] sm:$0xff]  ;;  %v136_v16 = vld [vmem:[%s719_s3 + $0x38] sm:$0xff] }
  0x17   :  { %449 = vmatpush3.bf16.msra.mxu1 %v448_v8  ;;  %471 = vmatprep.subr.bf16.mxu0 %v529_v0  ;;  %v454_v14 = vpack.c.bf16 %v134_v13, %v133_v12  ;;  %v457_v17 = vpack.c.bf16 %v136_v16, %v135_v15  ;;  %v137_v18 = vld [vmem:[%s719_s3 + $0x40] sm:$0xff]  ;;  %v138_v19 = vld [vmem:[%s719_s3 + $0x48] sm:$0xff]  ;;  %v139_v21 = vld [vmem:[%s719_s3 + $0x50] sm:$0xff] }
  0x18   :  { %450 = vmatprep.subr.bf16.mxu1 %v529_v0  ;;  %v460_v20 = vpack.c.bf16 %v138_v19, %v137_v18  ;;  %v140_v22 = vld [vmem:[%s719_s3 + $0x58] sm:$0xff]  ;;  %v141_v24 = vld [vmem:[%s719_s3 + $0x60] sm:$0xff]  ;;  %v142_v25 = vld [vmem:[%s719_s3 + $0x68] sm:$0xff] }
  0x19   :  { %371 = vmatmul.mubr.msk.f32.vlgmr.msra.gmra.mrb[0].mxu0 %vm50_vm4, %v40_v10  ;;  %v463_v23 = vpack.c.bf16 %v140_v22, %v139_v21  ;;  %v466_v26 = vpack.c.bf16 %v142_v25, %v141_v24  ;;  %v143_v27 = vld [vmem:[%s719_s3 + $0x70] sm:$0xff]  ;;  %v144_v28 = vld [vmem:[%s719_s3 + $0x78] sm:$0xff]  ;;  %v223_v30 = vld [vmem:[%s721_s5] sm:$0xff] }
  0x1a   :  { %440 = vmatprep.mubr.msk.f32.mxu0 %vm530_vm0, %v531_v1  ;;  %v469_v29 = vpack.c.bf16 %v144_v28, %v143_v27  ;;  %v224_v31 = vld [vmem:[%s721_s5 + $0x8] sm:$0xff]  ;;  %v225_v32 = vld [vmem:[%s721_s5 + $0x10] sm:$0xff]  ;;  %v226_v34 = vld [vmem:[%s721_s5 + $0x18] sm:$0xff] }
  0x1b   :  { %452 = vmatpush3.bf16.msra.mxu1 %v451_v11  ;;  %v472_v33 = vpack.c.bf16 %v224_v31, %v223_v30  ;;  %v475_v35 = vpack.c.bf16 %v226_v34, %v225_v32  ;;  %v227_v36 = vld [vmem:[%s721_s5 + $0x20] sm:$0xff]  ;;  %v228_v37 = vld [vmem:[%s721_s5 + $0x28] sm:$0xff]  ;;  %v229_v39 = vld [vmem:[%s721_s5 + $0x30] sm:$0xff] }
  0x1c   :  { %453 = vmatprep.subr.bf16.mxu1 %v529_v0  ;;  %v478_v38 = vpack.c.bf16 %v228_v37, %v227_v36  ;;  %v230_v40 = vld [vmem:[%s721_s5 + $0x38] sm:$0xff]  ;;  %v231_v42 = vld [vmem:[%s721_s5 + $0x40] sm:$0xff]  ;;  %v232_v43 = vld [vmem:[%s721_s5 + $0x48] sm:$0xff] }
  0x1d   :  { %473 = vmatpush3.bf16.msra.mxu0 %v472_v33  ;;  %v481_v41 = vpack.c.bf16 %v230_v40, %v229_v39  ;;  %v484_v44 = vpack.c.bf16 %v232_v43, %v231_v42  ;;  %v233_v45 = vld [vmem:[%s721_s5 + $0x50] sm:$0xff]  ;;  %v234_v46 = vld [vmem:[%s721_s5 + $0x58] sm:$0xff]  ;;  %v235_v48 = vld [vmem:[%s721_s5 + $0x60] sm:$0xff] }
  0x1e   :  { %474 = vmatprep.subr.bf16.mxu0 %v529_v0  ;;  %v487_v47 = vpack.c.bf16 %v234_v46, %v233_v45  ;;  %v236_v49 = vld [vmem:[%s721_s5 + $0x68] sm:$0xff]  ;;  %v324_v51 = vld [vmem:[%s718_s2] ss:$0 sm:$0xff]  ;;  %v237_v56 = vld [vmem:[%s721_s5 + $0x70] sm:$0xff] }
  0x1f   :  { %455 = vmatpush3.bf16.msra.mxu1 %v454_v14  ;;  %v490_v50 = vpack.c.bf16 %v236_v49, %v235_v48  ;;  %v238_v57 = vld [vmem:[%s721_s5 + $0x78] sm:$0xff]  ;;  %v327_v59 = vld [vmem:[%s720_s4] ss:$0 sm:$0xff] }
  0x20   :  { %456 = vmatprep.subr.bf16.mxu1 %v529_v0  ;;  %v493_v58 = vpack.c.bf16 %v238_v57, %v237_v56 }
  0x21   :  { %476 = vmatpush3.bf16.msra.mxu0 %v475_v35 }
  0x22   :  { %477 = vmatprep.subr.bf16.mxu0 %v529_v0 }
  0x23   :  { %458 = vmatpush3.bf16.msra.mxu1 %v457_v17 }
  0x24   :  { %459 = vmatprep.subr.bf16.mxu1 %v529_v0 }
  0x25   :  { %479 = vmatpush3.bf16.msra.mxu0 %v478_v38 }
  0x26   :  { %480 = vmatprep.subr.bf16.mxu0 %v529_v0 }
  0x27   :  { %461 = vmatpush3.bf16.msra.mxu1 %v460_v20 }
  0x28   :  { %462 = vmatprep.subr.bf16.mxu1 %v529_v0 }
  0x29   :  { %482 = vmatpush3.bf16.msra.mxu0 %v481_v41 }
  0x2a   :  { %483 = vmatprep.subr.bf16.mxu0 %v529_v0 }
  0x2b   :  { %464 = vmatpush3.bf16.msra.mxu1 %v463_v23 }
  0x2c   :  { %465 = vmatprep.subr.bf16.mxu1 %v529_v0 }
  0x2d   :  { %485 = vmatpush3.bf16.msra.mxu0 %v484_v44 }
  0x2e   :  { %486 = vmatprep.subr.bf16.mxu0 %v529_v0 }
  0x2f   :  { %467 = vmatpush3.bf16.msra.mxu1 %v466_v26 }
  0x30   :  { %468 = vmatprep.subr.bf16.mxu1 %v529_v0 }
  0x31   :  { %488 = vmatpush3.bf16.msra.mxu0 %v487_v47 }
  0x32   :  { %489 = vmatprep.subr.bf16.mxu0 %v529_v0 }
  0x33   :  { %470 = vmatpush3.bf16.msra.mxu1 %v469_v29 }
  0x35   :  { %491 = vmatpush3.bf16.msra.mxu0 %v490_v50 }
  0x36   :  { %492 = vmatprep.subr.bf16.mxu0 %v529_v0  ;;  %v328_v0 = vld [vmem:[%s722_s6] ss:$0 sm:$0xff] }
  0x39   :  { %494 = vmatpush3.bf16.msra.mxu0 %v493_v58 }
  0xec   :  { %v124_v52 = vpop.f32.mrb[0].mxu0 }
  0xed   :  { %v125_v53 = vadd.f32 %v324_v51, %v124_v52  ;;  %v372_v54 = vpop.f32.mrb[1].mxu0 }
  0xef   :  { %v128_v55 = vmax.f32 %v125_v53, 0.0 }
  0xf1   :  { %406 = vmatmul.mubr.f32.vlgmr.msra.gmra.mrb[0].mxu1 %v128_v55 }
 0x1c4   :  { %v218_v60 = vpop.f32.mrb[0].mxu1 }
 0x1c5   :  { %v219_v61 = vadd.f32 %v327_v59, %v218_v60  ;;  %v407_v62 = vpop.f32.mrb[1].mxu1 }
 0x1c7   :  { %v222_v63 = vmax.f32 %v219_v61, 0.0 }
 0x1c9   :  { %441 = vmatmul.mubr.f32.vlgmr.msra.gmra.mrb[2].mxu0 %v222_v63 }
 0x29c   :  { %v312_v1 = vpop.f32.mrb[2].mxu0 }
 0x29d   :  { %v313_v2 = vadd.f32 %v328_v0, %v312_v1  ;;  %v442_v3 = vpop.f32.mrb[3].mxu0 }
 0x29f   :  { %v316_v4 = vmul.f32 28.5, %v313_v2 }
 0x2a1   :  { %318 = vst.msk [vmem:[%s723_s7] sm:$0xff] %vm317_vm5, %v316_v4 }
 0x2a2   :  { %323 = vsyncpa [#allocation3], 1 }

</bundles_post_ra>
